<compile_context>
chip_gen: v6e
topology: v6e:2x2x1
jax: 0.10.0
libtpu: 0.0.40
codegen_flags: <defaults>
</compile_context>

<pallas_src>
import functools

import jax
import jax.numpy as jnp
from jax.experimental import pallas as pl
from jax.experimental.pallas import tpu as pltpu


def fused_gin_kernel(n_real,
                     src_t_ref, dst_ref, x_ref,
                     w11_ref, b11_ref, w12_ref, b12_ref, g1_ref, be1_ref,
                     w21_ref, b21_ref, w22_ref, b22_ref, g2_ref, be2_ref,
                     out_ref):
    x = x_ref[...]                                   # (Np, Dp) f32
    n_pad = x.shape[0]
    e_pad = dst_ref.shape[1]

    # Edge one-hots, built once in bf16 (0/1 exactly representable), reused by
    # both layers.  Padded edges carry index -1 and never match any node id.
    node_ids_en = jax.lax.broadcasted_iota(jnp.int32, (e_pad, n_pad), 1)
    src_onehot_t = (node_ids_en == src_t_ref[...]).astype(jnp.bfloat16)   # (E, N)
    node_ids_ne = jax.lax.broadcasted_iota(jnp.int32, (n_pad, e_pad), 0)
    dst_onehot = (node_ids_ne == dst_ref[...]).astype(jnp.bfloat16)       # (N, E)

    # Mask of real (non-padded) node rows, used only for the BN statistics.
    row_ids = jax.lax.broadcasted_iota(jnp.int32, (n_pad, 1), 0)
    row_mask = (row_ids < n_real).astype(jnp.float32)                     # (N, 1)
    inv_n = jnp.float32(1.0 / n_real)

    def aggregate(feat):
        # gathered[e, :] = feat[src[e], :]  (one 1 per row -> exact sum)
        gathered = jnp.dot(src_onehot_t, feat.astype(jnp.bfloat16),
                           preferred_element_type=jnp.float32)            # (E, D)
        # scattered[i, :] = sum_{e : dst[e] == i} gathered[e, :]  (f32 accum)
        scattered = jnp.dot(dst_onehot, gathered.astype(jnp.bfloat16),
                            preferred_element_type=jnp.float32)           # (N, D)
        # GINConv with train_eps=False: + (1 + eps) * x_i, eps = 0.
        return scattered + feat

    def mlp_bn(h, w1_ref, b1_ref, w2_ref, b2_ref, g_ref, be_ref):
        # Linear -> ReLU -> Linear -> ReLU (bf16 MXU inputs, f32 accumulation).
        h = jnp.dot(h.astype(jnp.bfloat16), w1_ref[...],
                    preferred_element_type=jnp.float32) + b1_ref[...]
        h = jnp.maximum(h, 0.0)
        h = jnp.dot(h.astype(jnp.bfloat16), w2_ref[...],
                    preferred_element_type=jnp.float32) + b2_ref[...]
        h = jnp.maximum(h, 0.0)
        # Training-mode BatchNorm1d (biased variance, eps=1e-5): single-pass
        # stats over real node rows only; gamma*rsqrt folded into one scale.
        hm = h * row_mask
        s1 = jnp.sum(hm, axis=0, keepdims=True)
        s2 = jnp.sum(hm * hm, axis=0, keepdims=True)
        mean = s1 * inv_n
        var = s2 * inv_n - mean * mean
        scale = g_ref[...] * jax.lax.rsqrt(var + 1e-5)
        return h * scale + (be_ref[...] - mean * scale)

    h1 = mlp_bn(aggregate(x), w11_ref, b11_ref, w12_ref, b12_ref,
                g1_ref, be1_ref)
    h2 = mlp_bn(aggregate(h1), w21_ref, b21_ref, w22_ref, b22_ref,
                g2_ref, be2_ref)
    out_ref[...] = h2                                # lane-dense (Np, Op) store


def _round_up(v, m):
    return ((v + m - 1) // m) * m


def _pad_axis(a, axis, new_size, value=0):
    pad = new_size - a.shape[axis]
    if pad <= 0:
        return a
    widths = [(0, 0)] * a.ndim
    widths[axis] = (0, pad)
    return jnp.pad(a, widths, constant_values=value)


@jax.jit
def my_gin_forward(x, edge_index, params):
    """myGIN.forward: two fused GINConv(MLP+BN) layers -> node embeddings."""
    w11, b11, w12, b12, g1, be1 = params["conv1"]
    w21, b21, w22, b22, g2, be2 = params["conv2"]

    n, in_dim = x.shape
    hidden = w12.shape[0]
    out_dim = w22.shape[1]
    e = edge_index.shape[1]

    n_pad = _round_up(n, 8)
    e_pad = _round_up(e, 128)
    d_pad = _round_up(in_dim, 128)
    h_pad = _round_up(hidden, 128)
    o_pad = _round_up(out_dim, 128)

    # Pad node features (zeros) and edges (-1 never matches a node id).
    x_p = _pad_axis(_pad_axis(x.astype(jnp.float32), 1, d_pad), 0, n_pad)
    ei_p = _pad_axis(edge_index.astype(jnp.int32), 1, e_pad, value=-1)
    src_t = ei_p[0, :].reshape(e_pad, 1)      # (E, 1) for the (E, N) one-hot
    dst_r = ei_p[1, :].reshape(1, e_pad)      # (1, E) for the (N, E) one-hot

    def pad_w(w, r, c):                       # weights -> zero-padded bf16
        return _pad_axis(_pad_axis(w, 1, c), 0, r).astype(jnp.bfloat16)

    def pad_v(v, c):                          # per-feature vectors -> (1, c) f32
        return _pad_axis(v.reshape(1, -1).astype(jnp.float32), 1, c)

    args = (
        src_t, dst_r, x_p,
        pad_w(w11, d_pad, h_pad), pad_v(b11, h_pad),
        pad_w(w12, h_pad, h_pad), pad_v(b12, h_pad),
        pad_v(g1, h_pad), pad_v(be1, h_pad),
        pad_w(w21, h_pad, h_pad), pad_v(b21, h_pad),
        pad_w(w22, h_pad, o_pad), pad_v(b22, o_pad),
        pad_v(g2, o_pad), pad_v(be2, o_pad),
    )

    flops = (
        4 * n_pad * e_pad * d_pad                                   # L1 gather+scatter
        + 2 * n_pad * d_pad * h_pad + 2 * n_pad * h_pad * h_pad     # L1 MLP
        + 4 * n_pad * e_pad * h_pad                                 # L2 gather+scatter
        + 2 * n_pad * h_pad * h_pad + 2 * n_pad * h_pad * o_pad)    # L2 MLP
    bytes_accessed = (sum(a.size * a.dtype.itemsize for a in args)
                      + n_pad * o_pad * 4)

    vmem = pl.BlockSpec(memory_space=pltpu.MemorySpace.VMEM)
    out_p = pl.pallas_call(
        functools.partial(fused_gin_kernel, n),
        out_shape=jax.ShapeDtypeStruct((n_pad, o_pad), jnp.float32),
        in_specs=[vmem] * len(args),
        out_specs=vmem,
        compiler_params=pltpu.CompilerParams(
            vmem_limit_bytes=64 * 1024 * 1024),
        cost_estimate=pl.CostEstimate(flops=flops,
                                      transcendentals=h_pad + o_pad,
                                      bytes_accessed=bytes_accessed),
    )(*args)

    return out_p[:n, :out_dim]


def init_params(key, in_dim, out_dim, hidden_dim):
    """Deterministic parameter init for the two GINConv MLPs.

    Linear weights are stored as (fan_in, fan_out) so the kernel does x @ W + b
    (equivalent to PyTorch's x @ W.T + b with W of shape (out, in))."""
    ks = jax.random.split(key, 4)

    def lin(k, fi, fo):
        scale = 1.0 / jnp.sqrt(fi)
        kw, kb = jax.random.split(k)
        w = jax.random.uniform(kw, (fi, fo), jnp.float32, -scale, scale)
        b = jax.random.uniform(kb, (fo,), jnp.float32, -scale, scale)
        return w, b

    # conv1: Linear(in, hid), Linear(hid, hid), BN(hid)
    w11, b11 = lin(ks[0], in_dim, hidden_dim)
    w12, b12 = lin(ks[1], hidden_dim, hidden_dim)
    g1 = jnp.ones((hidden_dim,), jnp.float32)
    be1 = jnp.zeros((hidden_dim,), jnp.float32)
    # conv2: Linear(hid, hid), Linear(hid, out), BN(out)
    w21, b21 = lin(ks[2], hidden_dim, hidden_dim)
    w22, b22 = lin(ks[3], hidden_dim, out_dim)
    g2 = jnp.ones((out_dim,), jnp.float32)
    be2 = jnp.zeros((out_dim,), jnp.float32)

    return dict(conv1=(w11, b11, w12, b12, g1, be1),
                conv2=(w21, b21, w22, b22, g2, be2))


if __name__ == "__main__":
    N, E = 16, 32            # nodes, edges
    IN_DIM, HIDDEN, OUT_DIM = 8, 32, 16

    key = jax.random.PRNGKey(0)
    kx, ke, kp = jax.random.split(key, 3)

    x = jax.random.normal(kx, (N, IN_DIM), jnp.float32)
    edge_index = jax.random.randint(ke, (2, E), 0, N, jnp.int32)
    params = init_params(kp, IN_DIM, OUT_DIM, HIDDEN)

    node_embeddings = my_gin_forward(x, edge_index, params)
    jax.block_until_ready(node_embeddings)
    assert node_embeddings.shape == (N, OUT_DIM)
    assert bool(jnp.all(jnp.isfinite(node_embeddings)))
    print("KERNEL_OK")
</pallas_src>

<mosaic_0001>
module attributes {stable_mosaic.version = 11 : i64} {
  func.func @fused_gin_kernel(%arg0: memref<128x1xi32, #tpu.memory_space<vmem>>, %arg1: memref<1x128xi32, #tpu.memory_space<vmem>>, %arg2: memref<16x128xf32, #tpu.memory_space<vmem>>, %arg3: memref<128x128xbf16, #tpu.memory_space<vmem>>, %arg4: memref<1x128xf32, #tpu.memory_space<vmem>>, %arg5: memref<128x128xbf16, #tpu.memory_space<vmem>>, %arg6: memref<1x128xf32, #tpu.memory_space<vmem>>, %arg7: memref<1x128xf32, #tpu.memory_space<vmem>>, %arg8: memref<1x128xf32, #tpu.memory_space<vmem>>, %arg9: memref<128x128xbf16, #tpu.memory_space<vmem>>, %arg10: memref<1x128xf32, #tpu.memory_space<vmem>>, %arg11: memref<128x128xbf16, #tpu.memory_space<vmem>>, %arg12: memref<1x128xf32, #tpu.memory_space<vmem>>, %arg13: memref<1x128xf32, #tpu.memory_space<vmem>>, %arg14: memref<1x128xf32, #tpu.memory_space<vmem>>, %arg15: memref<16x128xf32, #tpu.memory_space<vmem>>) attributes {dimension_semantics = [], scalar_prefetch = 0 : i64, scratch_operands = 0 : i64, tpu.core_type = #tpu.core_type<tc>} {
    %c0 = arith.constant 0 : index
    %c0_0 = arith.constant 0 : index
    %0 = vector.load %arg2[%c0, %c0_0] : memref<16x128xf32, #tpu.memory_space<vmem>>, vector<16x128xf32>
    %1 = tpu.iota {dimensions = array<i32: 1>} : vector<128x16xi32>
    %c0_1 = arith.constant 0 : index
    %c0_2 = arith.constant 0 : index
    %2 = vector.load %arg0[%c0_1, %c0_2] : memref<128x1xi32, #tpu.memory_space<vmem>>, vector<128x1xi32>
    %3 = vector.broadcast %2 : vector<128x1xi32> to vector<128x16xi32>
    %4 = arith.cmpi eq, %1, %3 : vector<128x16xi32>
    %5 = arith.extui %4 : vector<128x16xi1> to vector<128x16xi32>
    %6 = arith.sitofp %5 : vector<128x16xi32> to vector<128x16xf32>
    %7 = arith.truncf %6 : vector<128x16xf32> to vector<128x16xbf16>
    %8 = tpu.iota {dimensions = array<i32: 0>} : vector<16x128xi32>
    %c0_3 = arith.constant 0 : index
    %c0_4 = arith.constant 0 : index
    %9 = vector.load %arg1[%c0_3, %c0_4] : memref<1x128xi32, #tpu.memory_space<vmem>>, vector<1x128xi32>
    %10 = vector.broadcast %9 : vector<1x128xi32> to vector<16x128xi32>
    %11 = arith.cmpi eq, %8, %10 : vector<16x128xi32>
    %12 = arith.extui %11 : vector<16x128xi1> to vector<16x128xi32>
    %13 = arith.sitofp %12 : vector<16x128xi32> to vector<16x128xf32>
    %14 = arith.truncf %13 : vector<16x128xf32> to vector<16x128xbf16>
    %15 = tpu.iota {dimensions = array<i32: 0>} : vector<16x1xi32>
    %c16_i32 = arith.constant 16 : i32
    %16 = vector.broadcast %c16_i32 : i32 to vector<16x1xi32>
    %17 = arith.cmpi slt, %15, %16 : vector<16x1xi32>
    %18 = arith.extui %17 : vector<16x1xi1> to vector<16x1xi32>
    %19 = arith.sitofp %18 : vector<16x1xi32> to vector<16x1xf32>
    %20 = arith.truncf %0 : vector<16x128xf32> to vector<16x128xbf16>
    %cst = arith.constant dense<0.000000e+00> : vector<128x128xf32>
    %21 = tpu.matmul %7, %20, %cst {dimension_numbers = #tpu.dot_dimension_numbers<[1], [0], [0], [1], [0, 0, 1, 1], [], []>} : vector<128x16xbf16>, vector<16x128xbf16>, vector<128x128xf32> -> vector<128x128xf32>
    %22 = arith.truncf %21 : vector<128x128xf32> to vector<128x128xbf16>
    %cst_5 = arith.constant dense<0.000000e+00> : vector<16x128xf32>
    %23 = tpu.matmul %14, %22, %cst_5 {dimension_numbers = #tpu.dot_dimension_numbers<[1], [0], [0], [1], [0, 0, 1, 1], [], []>} : vector<16x128xbf16>, vector<128x128xbf16>, vector<16x128xf32> -> vector<16x128xf32>
    %24 = arith.addf %23, %0 : vector<16x128xf32>
    %25 = arith.truncf %24 : vector<16x128xf32> to vector<16x128xbf16>
    %c0_6 = arith.constant 0 : index
    %c0_7 = arith.constant 0 : index
    %26 = vector.load %arg3[%c0_6, %c0_7] : memref<128x128xbf16, #tpu.memory_space<vmem>>, vector<128x128xbf16>
    %cst_8 = arith.constant dense<0.000000e+00> : vector<16x128xf32>
    %27 = tpu.matmul %25, %26, %cst_8 {dimension_numbers = #tpu.dot_dimension_numbers<[1], [0], [0], [1], [0, 0, 1, 1], [], []>} : vector<16x128xbf16>, vector<128x128xbf16>, vector<16x128xf32> -> vector<16x128xf32>
    %c0_9 = arith.constant 0 : index
    %c0_10 = arith.constant 0 : index
    %28 = vector.load %arg4[%c0_9, %c0_10] : memref<1x128xf32, #tpu.memory_space<vmem>>, vector<1x128xf32>
    %29 = vector.broadcast %28 : vector<1x128xf32> to vector<16x128xf32>
    %30 = arith.addf %27, %29 : vector<16x128xf32>
    %cst_11 = arith.constant 0.000000e+00 : f32
    %31 = vector.broadcast %cst_11 : f32 to vector<16x128xf32>
    %32 = arith.maximumf %30, %31 : vector<16x128xf32>
    %33 = arith.truncf %32 : vector<16x128xf32> to vector<16x128xbf16>
    %c0_12 = arith.constant 0 : index
    %c0_13 = arith.constant 0 : index
    %34 = vector.load %arg5[%c0_12, %c0_13] : memref<128x128xbf16, #tpu.memory_space<vmem>>, vector<128x128xbf16>
    %cst_14 = arith.constant dense<0.000000e+00> : vector<16x128xf32>
    %35 = tpu.matmul %33, %34, %cst_14 {dimension_numbers = #tpu.dot_dimension_numbers<[1], [0], [0], [1], [0, 0, 1, 1], [], []>} : vector<16x128xbf16>, vector<128x128xbf16>, vector<16x128xf32> -> vector<16x128xf32>
    %c0_15 = arith.constant 0 : index
    %c0_16 = arith.constant 0 : index
    %36 = vector.load %arg6[%c0_15, %c0_16] : memref<1x128xf32, #tpu.memory_space<vmem>>, vector<1x128xf32>
    %37 = vector.broadcast %36 : vector<1x128xf32> to vector<16x128xf32>
    %38 = arith.addf %35, %37 : vector<16x128xf32>
    %cst_17 = arith.constant 0.000000e+00 : f32
    %39 = vector.broadcast %cst_17 : f32 to vector<16x128xf32>
    %40 = arith.maximumf %38, %39 : vector<16x128xf32>
    %41 = vector.broadcast %19 : vector<16x1xf32> to vector<16x128xf32>
    %42 = arith.mulf %40, %41 : vector<16x128xf32>
    %cst_18 = arith.constant dense<0.000000e+00> : vector<128xf32>
    %43 = vector.multi_reduction <add>, %42, %cst_18 [0] : vector<16x128xf32> to vector<128xf32>
    %44 = vector.shape_cast %43 : vector<128xf32> to vector<1x128xf32>
    %45 = arith.mulf %42, %42 : vector<16x128xf32>
    %cst_19 = arith.constant dense<0.000000e+00> : vector<128xf32>
    %46 = vector.multi_reduction <add>, %45, %cst_19 [0] : vector<16x128xf32> to vector<128xf32>
    %47 = vector.shape_cast %46 : vector<128xf32> to vector<1x128xf32>
    %cst_20 = arith.constant 6.250000e-02 : f32
    %48 = vector.broadcast %cst_20 : f32 to vector<1x128xf32>
    %49 = arith.mulf %44, %48 : vector<1x128xf32>
    %cst_21 = arith.constant 6.250000e-02 : f32
    %50 = vector.broadcast %cst_21 : f32 to vector<1x128xf32>
    %51 = arith.mulf %47, %50 : vector<1x128xf32>
    %52 = arith.mulf %49, %49 : vector<1x128xf32>
    %53 = arith.subf %51, %52 : vector<1x128xf32>
    %c0_22 = arith.constant 0 : index
    %c0_23 = arith.constant 0 : index
    %54 = vector.load %arg7[%c0_22, %c0_23] : memref<1x128xf32, #tpu.memory_space<vmem>>, vector<1x128xf32>
    %cst_24 = arith.constant 9.99999974E-6 : f32
    %55 = vector.broadcast %cst_24 : f32 to vector<1x128xf32>
    %56 = arith.addf %53, %55 : vector<1x128xf32>
    %57 = math.rsqrt %56 : vector<1x128xf32>
    %58 = arith.mulf %54, %57 : vector<1x128xf32>
    %59 = vector.broadcast %58 : vector<1x128xf32> to vector<16x128xf32>
    %60 = arith.mulf %40, %59 : vector<16x128xf32>
    %c0_25 = arith.constant 0 : index
    %c0_26 = arith.constant 0 : index
    %61 = vector.load %arg8[%c0_25, %c0_26] : memref<1x128xf32, #tpu.memory_space<vmem>>, vector<1x128xf32>
    %62 = arith.mulf %49, %58 : vector<1x128xf32>
    %63 = arith.subf %61, %62 : vector<1x128xf32>
    %64 = vector.broadcast %63 : vector<1x128xf32> to vector<16x128xf32>
    %65 = arith.addf %60, %64 : vector<16x128xf32>
    %66 = arith.truncf %65 : vector<16x128xf32> to vector<16x128xbf16>
    %cst_27 = arith.constant dense<0.000000e+00> : vector<128x128xf32>
    %67 = tpu.matmul %7, %66, %cst_27 {dimension_numbers = #tpu.dot_dimension_numbers<[1], [0], [0], [1], [0, 0, 1, 1], [], []>} : vector<128x16xbf16>, vector<16x128xbf16>, vector<128x128xf32> -> vector<128x128xf32>
    %68 = arith.truncf %67 : vector<128x128xf32> to vector<128x128xbf16>
    %cst_28 = arith.constant dense<0.000000e+00> : vector<16x128xf32>
    %69 = tpu.matmul %14, %68, %cst_28 {dimension_numbers = #tpu.dot_dimension_numbers<[1], [0], [0], [1], [0, 0, 1, 1], [], []>} : vector<16x128xbf16>, vector<128x128xbf16>, vector<16x128xf32> -> vector<16x128xf32>
    %70 = arith.addf %69, %65 : vector<16x128xf32>
    %71 = arith.truncf %70 : vector<16x128xf32> to vector<16x128xbf16>
    %c0_29 = arith.constant 0 : index
    %c0_30 = arith.constant 0 : index
    %72 = vector.load %arg9[%c0_29, %c0_30] : memref<128x128xbf16, #tpu.memory_space<vmem>>, vector<128x128xbf16>
    %cst_31 = arith.constant dense<0.000000e+00> : vector<16x128xf32>
    %73 = tpu.matmul %71, %72, %cst_31 {dimension_numbers = #tpu.dot_dimension_numbers<[1], [0], [0], [1], [0, 0, 1, 1], [], []>} : vector<16x128xbf16>, vector<128x128xbf16>, vector<16x128xf32> -> vector<16x128xf32>
    %c0_32 = arith.constant 0 : index
    %c0_33 = arith.constant 0 : index
    %74 = vector.load %arg10[%c0_32, %c0_33] : memref<1x128xf32, #tpu.memory_space<vmem>>, vector<1x128xf32>
    %75 = vector.broadcast %74 : vector<1x128xf32> to vector<16x128xf32>
    %76 = arith.addf %73, %75 : vector<16x128xf32>
    %cst_34 = arith.constant 0.000000e+00 : f32
    %77 = vector.broadcast %cst_34 : f32 to vector<16x128xf32>
    %78 = arith.maximumf %76, %77 : vector<16x128xf32>
    %79 = arith.truncf %78 : vector<16x128xf32> to vector<16x128xbf16>
    %c0_35 = arith.constant 0 : index
    %c0_36 = arith.constant 0 : index
    %80 = vector.load %arg11[%c0_35, %c0_36] : memref<128x128xbf16, #tpu.memory_space<vmem>>, vector<128x128xbf16>
    %cst_37 = arith.constant dense<0.000000e+00> : vector<16x128xf32>
    %81 = tpu.matmul %79, %80, %cst_37 {dimension_numbers = #tpu.dot_dimension_numbers<[1], [0], [0], [1], [0, 0, 1, 1], [], []>} : vector<16x128xbf16>, vector<128x128xbf16>, vector<16x128xf32> -> vector<16x128xf32>
    %c0_38 = arith.constant 0 : index
    %c0_39 = arith.constant 0 : index
    %82 = vector.load %arg12[%c0_38, %c0_39] : memref<1x128xf32, #tpu.memory_space<vmem>>, vector<1x128xf32>
    %83 = vector.broadcast %82 : vector<1x128xf32> to vector<16x128xf32>
    %84 = arith.addf %81, %83 : vector<16x128xf32>
    %cst_40 = arith.constant 0.000000e+00 : f32
    %85 = vector.broadcast %cst_40 : f32 to vector<16x128xf32>
    %86 = arith.maximumf %84, %85 : vector<16x128xf32>
    %87 = vector.broadcast %19 : vector<16x1xf32> to vector<16x128xf32>
    %88 = arith.mulf %86, %87 : vector<16x128xf32>
    %cst_41 = arith.constant dense<0.000000e+00> : vector<128xf32>
    %89 = vector.multi_reduction <add>, %88, %cst_41 [0] : vector<16x128xf32> to vector<128xf32>
    %90 = vector.shape_cast %89 : vector<128xf32> to vector<1x128xf32>
    %91 = arith.mulf %88, %88 : vector<16x128xf32>
    %cst_42 = arith.constant dense<0.000000e+00> : vector<128xf32>
    %92 = vector.multi_reduction <add>, %91, %cst_42 [0] : vector<16x128xf32> to vector<128xf32>
    %93 = vector.shape_cast %92 : vector<128xf32> to vector<1x128xf32>
    %cst_43 = arith.constant 6.250000e-02 : f32
    %94 = vector.broadcast %cst_43 : f32 to vector<1x128xf32>
    %95 = arith.mulf %90, %94 : vector<1x128xf32>
    %cst_44 = arith.constant 6.250000e-02 : f32
    %96 = vector.broadcast %cst_44 : f32 to vector<1x128xf32>
    %97 = arith.mulf %93, %96 : vector<1x128xf32>
    %98 = arith.mulf %95, %95 : vector<1x128xf32>
    %99 = arith.subf %97, %98 : vector<1x128xf32>
    %c0_45 = arith.constant 0 : index
    %c0_46 = arith.constant 0 : index
    %100 = vector.load %arg13[%c0_45, %c0_46] : memref<1x128xf32, #tpu.memory_space<vmem>>, vector<1x128xf32>
    %cst_47 = arith.constant 9.99999974E-6 : f32
    %101 = vector.broadcast %cst_47 : f32 to vector<1x128xf32>
    %102 = arith.addf %99, %101 : vector<1x128xf32>
    %103 = math.rsqrt %102 : vector<1x128xf32>
    %104 = arith.mulf %100, %103 : vector<1x128xf32>
    %105 = vector.broadcast %104 : vector<1x128xf32> to vector<16x128xf32>
    %106 = arith.mulf %86, %105 : vector<16x128xf32>
    %c0_48 = arith.constant 0 : index
    %c0_49 = arith.constant 0 : index
    %107 = vector.load %arg14[%c0_48, %c0_49] : memref<1x128xf32, #tpu.memory_space<vmem>>, vector<1x128xf32>
    %108 = arith.mulf %95, %104 : vector<1x128xf32>
    %109 = arith.subf %107, %108 : vector<1x128xf32>
    %110 = vector.broadcast %109 : vector<1x128xf32> to vector<16x128xf32>
    %111 = arith.addf %106, %110 : vector<16x128xf32>
    %c0_50 = arith.constant 0 : index
    %c0_51 = arith.constant 0 : index
    %112 = vector.load %arg15[%c0_50, %c0_51] : memref<16x128xf32, #tpu.memory_space<vmem>>, vector<16x128xf32>
    tpu.vector_store %arg15[%c0_50, %c0_51], %111 {strides = array<i32>} : memref<16x128xf32, #tpu.memory_space<vmem>>, vector<16x128xf32>,
    return
  }
}

</mosaic_0001>

<bundles_post_ra>
// kernel: my_gin_forward.1
= control target key start
LH: loop header
LB: loop body
LE: loop exit
PB: predicated region body
PF: predicated region fallthrough
CT: control target
= control target key end

     0   :  { %v1454_v2 = vmov 0   ;;  %v1455_v5 = vmov 0.0   ;;  %s1902_s0 = inlined_call_operand.vmem [shape: s32[128,1], index: 0, kind: input, shape index: {}]   ;;  %s1903_s1 = inlined_call_operand.vmem [shape: s32[1,128], index: 1, kind: input, shape index: {}]   ;;  %s1904_s2 = inlined_call_operand.vmem [shape: f32[16,128], index: 2, kind: input, shape index: {}]   ;;  %s1905_s3 = inlined_call_operand.vmem [shape: bf16[128,128], index: 3, kind: input, shape index: {}]   ;;  %s1906_s4 = inlined_call_operand.vmem [shape: f32[1,128], index: 4, kind: input, shape index: {}]   ;;  %s1907_s5 = inlined_call_operand.vmem [shape: bf16[128,128], index: 5, kind: input, shape index: {}]   ;;  %s1908_s6 = inlined_call_operand.vmem [shape: f32[1,128], index: 6, kind: input, shape index: {}]   ;;  %s1909_s7 = inlined_call_operand.vmem [shape: f32[1,128], index: 7, kind: input, shape index: {}]   ;;  %s1910_s8 = inlined_call_operand.vmem [shape: f32[1,128], index: 8, kind: input, shape index: {}]   ;;  %s1911_s9 = inlined_call_operand.vmem [shape: bf16[128,128], index: 9, kind: input, shape index: {}]   ;;  %s1912_s10 = inlined_call_operand.vmem [shape: f32[1,128], index: 10, kind: input, shape index: {}]   ;;  %s1913_s11 = inlined_call_operand.vmem [shape: bf16[128,128], index: 11, kind: input, shape index: {}]   ;;  %s1914_s12 = inlined_call_operand.vmem [shape: f32[1,128], index: 12, kind: input, shape index: {}]   ;;  %s1915_s13 = inlined_call_operand.vmem [shape: f32[1,128], index: 13, kind: input, shape index: {}]   ;;  %s1916_s14 = inlined_call_operand.vmem [shape: f32[1,128], index: 14, kind: input, shape index: {}]   ;;  %s1917_s15 = inlined_call_operand.hbm [shape: f32[16,128], index: 15, kind: output, shape index: {}]  }
   0x1   :  { %v58_v0 = vld [vmem:[%s1902_s0 + $0x10] sm:$0xff]  ;;  %v56_v1 = vld [vmem:[%s1902_s0] sm:$0xff]  ;;  %1395 = vset.pattern.permute.xlu1 %v1454_v2  ;;  %1394 = vset.pattern.permute.xlu0 %v1454_v2  ;;  %v59_v3 = vld [vmem:[%s1902_s0 + $0x18] sm:$0xff] }
   0x2   :  { %79 = vperm.xlu1 %1395, %v58_v0   ;;  %73 = vperm.xlu0 %1394, %v56_v1   ;;  %v57_v4 = vld [vmem:[%s1902_s0 + $0x8] sm:$0xff]  ;;  %v60_v7 = vld [vmem:[%s1902_s0 + $0x20] sm:$0xff]  ;;  %v63_v11 = vld [vmem:[%s1902_s0 + $0x38] sm:$0xff] }
   0x3   :  { %1269 = vmatprep.subr.bf16.mxu0 %v1455_v5  ;;  %v61_v6 = vld [vmem:[%s1902_s0 + $0x28] sm:$0xff]  ;;  %v1563_v8 = vld [vmem:[%s1904_s2] sm:$0xff]  ;;  %v62_v12 = vld [vmem:[%s1902_s0 + $0x30] sm:$0xff] }
   0x4   :  { %v1568_v9 = vld [vmem:[%s1904_s2 + $0x8] sm:$0xff]  ;;  %v64_v14 = vld [vmem:[%s1902_s0 + $0x40] sm:$0xff]  ;;  %v67_v15 = vld [vmem:[%s1902_s0 + $0x58] sm:$0xff] }
   0x5   :  { %v197_v10 = vpack.c.bf16 %v1568_v9, %v1563_v8  ;;  %v65_v13 = vld [vmem:[%s1902_s0 + $0x48] sm:$0xff]  ;;  %v66_v16 = vld [vmem:[%s1902_s0 + $0x50] sm:$0xff]  ;;  %v68_v18 = vld [vmem:[%s1902_s0 + $0x60] sm:$0xff] }
   0x6   :  { %82 = vperm.xlu1 %1395, %v59_v3   ;;  %76 = vperm.xlu0 %1394, %v57_v4   ;;  %v69_v17 = vld [vmem:[%s1902_s0 + $0x68] sm:$0xff]  ;;  %v71_v19 = vld [vmem:[%s1902_s0 + $0x78] sm:$0xff]  ;;  %v70_v20 = vld [vmem:[%s1902_s0 + $0x70] sm:$0xff] }
   0x7   :  { %1231 = vmatprep.subr.bf16.mxu1 %v197_v10 }
   0x8   :  { %1232 = vmatpush3.bf16.msra.mxu1 %v197_v10 }
   0x9   :  { %1249 = vmatprep.subr.bf16.mxu1 %v1455_v5 }
   0xa   :  { %88 = vperm.xlu1 %1395, %v61_v6   ;;  %85 = vperm.xlu0 %1394, %v60_v7  }
   0xe   :  { %94 = vperm.xlu1 %1395, %v63_v11   ;;  %91 = vperm.xlu0 %1394, %v62_v12  }
  0x12   :  { %100 = vperm.xlu1 %1395, %v65_v13   ;;  %97 = vperm.xlu0 %1394, %v64_v14  }
  0x16   :  { %106 = vperm.xlu1 %1395, %v67_v15   ;;  %103 = vperm.xlu0 %1394, %v66_v16  }
  0x1a   :  { %112 = vperm.xlu1 %1395, %v69_v17   ;;  %109 = vperm.xlu0 %1394, %v68_v18  }
  0x1b   :  { %20 = vsyncpa [#allocation3], 0  ;;  %v54_v21 = vlaneseq  ;;  %vm198_vm4 = vcmask 130048   ;;  %v1396_v63 = vld [vmem:[%s1905_s3 + $0x38] sm:$0xff]   ;;  %v1397_v0 = vld [vmem:[%s1905_s3 + $0x30] sm:$0xff]   ;;  %s1458_s17 = smov [#allocation2]  }
  0x1c   :  { %1270 = vmatpush3.bf16.msra.mxu0 %v1396_v63  ;;  %v1398_v1 = vld [vmem:[%s1905_s3 + $0x28] sm:$0xff]   ;;  %v1399_v2 = vld [vmem:[%s1905_s3 + $0x20] sm:$0xff]   ;;  %v1400_v3 = vld [vmem:[%s1905_s3 + $0x18] sm:$0xff]   ;;  %s1073_s18 = sshll.u32 %s1458_s17, 4  ;;  %s1074_s18 = int_to_ptr.vmem [resolvable:$true] %s1073_s18 }
  0x1d   :  { %v1604_v22 = vand.u32 127, %v54_v21  ;;  %1271 = vmatprep.subr.bf16.mxu0 %v1455_v5  ;;  %v1401_v4 = vld [vmem:[%s1905_s3 + $0x10] sm:$0xff]   ;;  %p1437_p1 = scmp.lt.s32.totalorder %s1074_s18, %s1074_s18 }
  0x1e   :  { %118 = vperm.xlu1 %1395, %v71_v19   ;;  %115 = vperm.xlu0 %1394, %v70_v20  }
  0x20   :  { %1272 = vmatpush3.bf16.msra.mxu0 %v1397_v0 }
  0x21   :  { %1273 = vmatprep.subr.bf16.mxu0 %v1455_v5 }
  0x24   :  { %1274 = vmatpush3.bf16.msra.mxu0 %v1398_v1 }
  0x25   :  { %1275 = vmatprep.subr.bf16.mxu0 %v1455_v5 }
  0x28   :  { %1276 = vmatpush3.bf16.msra.mxu0 %v1399_v2 }
  0x29   :  { %1277 = vmatprep.subr.bf16.mxu0 %v1455_v5 }
  0x2c   :  { %1278 = vmatpush3.bf16.msra.mxu0 %v1400_v3 }
  0x2d   :  { %1279 = vmatprep.subr.bf16.mxu0 %v1455_v5 }
  0x30   :  { %1280 = vmatpush3.bf16.msra.mxu0 %v1401_v4 }
  0x31   :  { %1281 = vmatprep.subr.bf16.mxu0 %v1455_v5 }
  0x7d   :  { %v80_v23 = vpop.permute.xlu1 %79  ;;  %v74_v24 = vpop.permute.xlu0 %73 }
  0x7e   :  { %vm122_vm0 = vcmp.eq.s32.totalorder %v1604_v22, %v80_v23  ;;  %vm120_vm1 = vcmp.eq.s32.totalorder %v1604_v22, %v74_v24 }
  0x7f   :  { %v1086_v27 = vsel %vm122_vm0, 1.0, %v1455_v5  ;;  %v1084_v28 = vsel %vm120_vm1, 1.0, %v1455_v5  ;;  %vm1456_vm1 = vmmov 0  }
  0x80   :  { %1285 = vmatprep.mubr.msk.bf16.mxu0 %vm1456_vm1, %v1455_v5 }
  0x81   :  { %v83_v25 = vpop.permute.xlu1 %82  ;;  %v77_v26 = vpop.permute.xlu0 %76 }
  0x82   :  { %vm123_vm2 = vcmp.eq.s32.totalorder %v1604_v22, %v83_v25  ;;  %vm121_vm3 = vcmp.eq.s32.totalorder %v1604_v22, %v77_v26 }
  0x83   :  { %v1087_v29 = vsel %vm123_vm2, 1.0, %v1455_v5  ;;  %v1085_v30 = vsel %vm121_vm3, 1.0, %v1455_v5 }
  0x84   :  { %v1614_v31 = vpack.c.bf16 %v1087_v29, %v1086_v27  ;;  %v1616_v32 = vpack.c.bf16 %v1085_v30, %v1084_v28  ;;  %v1704_v30 = vshrl.u32 %v54_v21, 7  ;;  %v1420_v21 = vld [vmem:[%s1913_s11 + $0x38] sm:$0xff]  }
  0x85   :  { %v89_v33 = vpop.permute.xlu1 %88  ;;  %v86_v34 = vpop.permute.xlu0 %85 }
  0x86   :  { %vm125_vm5 = vcmp.eq.s32.totalorder %v1604_v22, %v89_v33  ;;  %vm124_vm6 = vcmp.eq.s32.totalorder %v1604_v22, %v86_v34  ;;  %1233 = vmatprep.mubr.msk.bf16.mxu1 %vm198_vm4, %v1616_v32  ;;  %v178_v34 = vadd.s32 8, %v1704_v30 }
  0x87   :  { %v1089_v35 = vsel %vm125_vm5, 1.0, %v1455_v5  ;;  %v1088_v36 = vsel %vm124_vm6, 1.0, %v1455_v5  ;;  %1234 = vmatmul.mubr.msk.bf16.vlgmr.msra.gmra.mxu1 %vm198_vm4, %v1614_v31 }
  0x88   :  { %v1626_v37 = vpack.c.bf16 %v1089_v35, %v1088_v36  ;;  %v1100_v36 = vld [vmem:[%s1903_s1] ss:$0 sm:$0xff] }
  0x89   :  { %v95_v38 = vpop.permute.xlu1 %94  ;;  %v92_v39 = vpop.permute.xlu0 %91  ;;  %vm184_vm2 = vcmp.eq.s32.totalorder %v1704_v30, %v1100_v36  ;;  %vm185_vm3 = vcmp.eq.s32.totalorder %v178_v34, %v1100_v36 }
  0x8a   :  { %vm127_vm7 = vcmp.eq.s32.totalorder %v1604_v22, %v95_v38  ;;  %vm126_vm8 = vcmp.eq.s32.totalorder %v1604_v22, %v92_v39  ;;  %1237 = vmatprep.mubr.msk.bf16.mxu1 %vm198_vm4, %v1626_v37  ;;  %vm1713_vm5 = vmpackc.low %vm185_vm3, %vm184_vm2  ;;  %v1457_v39 = vmov 1.0|1.0  }
  0x8b   :  { %v1091_v40 = vsel %vm127_vm7, 1.0, %v1455_v5  ;;  %v1090_v41 = vsel %vm126_vm8, 1.0, %v1455_v5 }
  0x8c   :  { %v1634_v42 = vpack.c.bf16 %v1091_v40, %v1090_v41  ;;  %v1402_v40 = vld [vmem:[%s1905_s3 + $0x8] sm:$0xff]   ;;  %v1403_v41 = vld [vmem:[%s1905_s3] sm:$0xff]  }
  0x8d   :  { %v101_v43 = vpop.permute.xlu1 %100  ;;  %v98_v44 = vpop.permute.xlu0 %97  ;;  %1282 = vmatpush3.bf16.msra.mxu0 %v1402_v40 }
  0x8e   :  { %vm129_vm9 = vcmp.eq.s32.totalorder %v1604_v22, %v101_v43  ;;  %vm128_vm10 = vcmp.eq.s32.totalorder %v1604_v22, %v98_v44  ;;  %1283 = vmatprep.subr.bf16.mxu0 %v1455_v5  ;;  %v1404_v43 = vld [vmem:[%s1907_s5 + $0x38] sm:$0xff]   ;;  %v1405_v44 = vld [vmem:[%s1907_s5 + $0x30] sm:$0xff]  }
  0x8f   :  { %v1093_v45 = vsel %vm129_vm9, 1.0, %v1455_v5  ;;  %v1092_v46 = vsel %vm128_vm10, 1.0, %v1455_v5  ;;  %1238 = vmatmul.mubr.msk.bf16.gmra.mxu1 %vm198_vm4, %v1634_v42 }
  0x90   :  { %v1642_v47 = vpack.c.bf16 %v1093_v45, %v1092_v46  ;;  %v1406_v45 = vld [vmem:[%s1907_s5 + $0x28] sm:$0xff]   ;;  %v1407_v46 = vld [vmem:[%s1907_s5 + $0x20] sm:$0xff]  }
  0x91   :  { %v107_v48 = vpop.permute.xlu1 %106  ;;  %v104_v49 = vpop.permute.xlu0 %103  ;;  %1284 = vmatpush3.bf16.msra.mxu0 %v1403_v41 }
  0x92   :  { %vm131_vm11 = vcmp.eq.s32.totalorder %v1604_v22, %v107_v48  ;;  %vm130_vm12 = vcmp.eq.s32.totalorder %v1604_v22, %v104_v49  ;;  %1241 = vmatprep.mubr.msk.bf16.mxu1 %vm198_vm4, %v1642_v47  ;;  %v1408_v48 = vld [vmem:[%s1907_s5 + $0x18] sm:$0xff]  }
  0x93   :  { %v1095_v50 = vsel %vm131_vm11, 1.0, %v1455_v5  ;;  %v1094_v51 = vsel %vm130_vm12, 1.0, %v1455_v5 }
  0x94   :  { %v1650_v52 = vpack.c.bf16 %v1095_v50, %v1094_v51 }
  0x95   :  { %v113_v53 = vpop.permute.xlu1 %112  ;;  %v110_v54 = vpop.permute.xlu0 %109 }
  0x96   :  { %vm133_vm13 = vcmp.eq.s32.totalorder %v1604_v22, %v113_v53  ;;  %vm132_vm14 = vcmp.eq.s32.totalorder %v1604_v22, %v110_v54 }
  0x97   :  { %v1097_v55 = vsel %vm133_vm13, 1.0, %v1455_v5  ;;  %v1096_v56 = vsel %vm132_vm14, 1.0, %v1455_v5  ;;  %1242 = vmatmul.mubr.msk.bf16.gmra.mxu1 %vm198_vm4, %v1650_v52 }
  0x98   :  { %v1658_v57 = vpack.c.bf16 %v1097_v55, %v1096_v56 }
  0x99   :  { %v119_v58 = vpop.permute.xlu1 %118  ;;  %v116_v59 = vpop.permute.xlu0 %115 }
  0x9a   :  { %vm135_vm15 = vcmp.eq.s32.totalorder %v1604_v22, %v119_v58  ;;  %vm134_vm0 = vcmp.eq.s32.totalorder %v1604_v22, %v116_v59  ;;  %1245 = vmatprep.mubr.msk.bf16.mxu1 %vm198_vm4, %v1658_v57  ;;  %v1409_v58 = vld [vmem:[%s1907_s5 + $0x10] sm:$0xff]   ;;  %v1410_v59 = vld [vmem:[%s1907_s5 + $0x8] sm:$0xff]  }
  0x9b   :  { %v1099_v60 = vsel %vm135_vm15, 1.0, %v1455_v5  ;;  %v1098_v61 = vsel %vm134_vm0, 1.0, %v1455_v5 }
  0x9c   :  { %v1666_v62 = vpack.c.bf16 %v1099_v60, %v1098_v61 }
  0x9f   :  { %1246 = vmatmul.mubr.msk.bf16.gmra.mxu1 %vm198_vm4, %v1666_v62 }
  0xa0   :  { %1265 = vmatprep.mubr.msk.bf16.mxu1 %vm1456_vm1, %v1455_v5 }
 0x147   :  { %v1235_v6 = vpop.f32.mrf.mxu1 }
 0x149   :  { %v257_v7 = vpop.f32.mrf.mxu1 }
 0x14b   :  { %v1236_v10 = vpop.f32.mrf.mxu1 }
 0x14c   :  { %v321_v35 = vpack.c.bf16 %v1236_v10, %v1235_v6  ;;  %v1122_v6 = vld [vmem:[%s1908_s6] ss:$0 sm:$0xff] }
 0x14d   :  { %v260_v11 = vpop.f32.mrf.mxu1 }
 0x14e   :  { %v320_v38 = vpack.c.bf16 %v260_v11, %v257_v7 }
 0x14f   :  { %v1239_v12 = vpop.f32.mrf.mxu1 }
 0x151   :  { %v273_v13 = vpop.f32.mrf.mxu1 }
 0x153   :  { %v1240_v14 = vpop.f32.mrf.mxu1 }
 0x154   :  { %v323_v29 = vpack.c.bf16 %v1240_v14, %v1239_v12 }
 0x155   :  { %v276_v15 = vpop.f32.mrf.mxu1 }
 0x156   :  { %v322_v33 = vpack.c.bf16 %v276_v15, %v273_v13 }
 0x157   :  { %v1243_v16 = vpop.f32.mrf.mxu1 }
 0x159   :  { %v289_v17 = vpop.f32.mrf.mxu1 }
 0x15b   :  { %v1244_v18 = vpop.f32.mrf.mxu1 }
 0x15c   :  { %v325_v27 = vpack.c.bf16 %v1244_v18, %v1243_v16 }
 0x15d   :  { %v292_v19 = vpop.f32.mrf.mxu1 }
 0x15e   :  { %v324_v28 = vpack.c.bf16 %v292_v19, %v289_v17 }
 0x15f   :  { %v1247_v20 = vpop.f32.mrf.mxu1 }
 0x161   :  { %v305_v22 = vpop.f32.mrf.mxu1 }
 0x163   :  { %v1248_v23 = vpop.f32.mrf.mxu1 }
 0x164   :  { %v327_v24 = vpack.c.bf16 %v1248_v23, %v1247_v20 }
 0x165   :  { %v308_v25 = vpop.f32.mrf.mxu1 }
 0x166   :  { %1250 = vmatpush3.bf16.msra.mxu1 %v327_v24  ;;  %v326_v26 = vpack.c.bf16 %v308_v25, %v305_v22 }
 0x167   :  { %1251 = vmatprep.subr.bf16.mxu1 %v1455_v5 }
 0x16a   :  { %1252 = vmatpush3.bf16.msra.mxu1 %v326_v26 }
 0x16b   :  { %1253 = vmatprep.subr.bf16.mxu1 %v1455_v5 }
 0x16e   :  { %1254 = vmatpush3.bf16.msra.mxu1 %v325_v27 }
 0x16f   :  { %1255 = vmatprep.subr.bf16.mxu1 %v1455_v5 }
 0x172   :  { %1256 = vmatpush3.bf16.msra.mxu1 %v324_v28 }
 0x173   :  { %1257 = vmatprep.subr.bf16.mxu1 %v1455_v5 }
 0x176   :  { %1258 = vmatpush3.bf16.msra.mxu1 %v323_v29 }
 0x177   :  { %1259 = vmatprep.subr.bf16.mxu1 %v1455_v5 }
 0x17a   :  { %1260 = vmatpush3.bf16.msra.mxu1 %v322_v33 }
 0x17b   :  { %1261 = vmatprep.subr.bf16.mxu1 %v1455_v5 }
 0x17e   :  { %1262 = vmatpush3.bf16.msra.mxu1 %v321_v35 }
 0x17f   :  { %1263 = vmatprep.subr.bf16.mxu1 %v1455_v5 }
 0x182   :  { %1264 = vmatpush3.bf16.msra.mxu1 %v320_v38 }
 0x183   :  { %1289 = vmatprep.subr.bf16.mxu1 %v1455_v5 }
 0x185   :  { %1266 = vmatmul.mubr.msk.bf16.vlgmr.msra.gmra.mxu1 %vm1713_vm5, %v1457_v39 }
 0x186   :  { %1305 = vmatprep.mubr.msk.bf16.mxu1 %vm1456_vm1, %v1455_v5  ;;  %1290 = vmatpush3.bf16.msra.mxu1 %v1404_v43 }
 0x187   :  { %1291 = vmatprep.subr.bf16.mxu1 %v1455_v5 }
 0x18a   :  { %1292 = vmatpush3.bf16.msra.mxu1 %v1405_v44 }
 0x18b   :  { %1293 = vmatprep.subr.bf16.mxu1 %v1455_v5 }
 0x18e   :  { %1294 = vmatpush3.bf16.msra.mxu1 %v1406_v45  ;;  %v621_v45 = vld [vmem:[%s1909_s7] sm:$0x1] }
 0x18f   :  { %1295 = vmatprep.subr.bf16.mxu1 %v1455_v5 }
 0x192   :  { %1296 = vmatpush3.bf16.msra.mxu1 %v1407_v46  ;;  %v1778_v46 = vsub.s32 0, %v1704_v30 }
 0x193   :  { %1297 = vmatprep.subr.bf16.mxu1 %v1455_v5 }
 0x196   :  { %1298 = vmatpush3.bf16.msra.mxu1 %v1408_v48 }
 0x197   :  { %1299 = vmatprep.subr.bf16.mxu1 %v1455_v5 }
 0x19a   :  { %1300 = vmatpush3.bf16.msra.mxu1 %v1409_v58 }
 0x19b   :  { %1301 = vmatprep.subr.bf16.mxu1 %v1455_v5 }
 0x19e   :  { %1302 = vmatpush3.bf16.msra.mxu1 %v1410_v59 }
 0x19f   :  { %1303 = vmatprep.subr.bf16.mxu1 %v1455_v5 }
 0x245   :  { %v362_v49 = vpop.f32.mrf.mxu1 }
 0x246   :  { %v363_v53 = vadd.f32 %v362_v49, %v1563_v8  ;;  %v1411_v8 = vld [vmem:[%s1907_s5] sm:$0xff]  }
 0x247   :  { %v1267_v50 = vpop.f32.mrf.mxu1  ;;  %1304 = vmatpush3.bf16.msra.mxu1 %v1411_v8 }
 0x248   :  { %1347 = vmatprep.subr.bf16.mxu1 %v1455_v5  ;;  %v633_v50 = vld [vmem:[%s1910_s8] sm:$0x1] }
 0x249   :  { %v365_v51 = vpop.f32.mrf.mxu1 }
 0x24a   :  { %v366_v54 = vadd.f32 %v365_v51, %v1568_v9  ;;  %v1113_v9 = vld [vmem:[%s1906_s4] ss:$0 sm:$0xff] }
 0x24b   :  { %v1268_v55 = vpop.f32.mrf.mxu1 }
 0x24c   :  { %v369_v56 = vpack.c.bf16 %v366_v54, %v363_v53 }
 0x24e   :  { %1286 = vmatmul.mubr.bf16.vlgmr.msra.gmra.mxu0 %v369_v56 }
 0x24f   :  { %1311 = vmatprep.mubr.msk.bf16.mxu0 %vm198_vm4, %v1616_v32 }
 0x30e   :  { %v475_v32 = vpop.f32.mrf.mxu0 }
 0x30f   :  { %v476_v61 = vadd.f32 %v1113_v9, %v475_v32 }
 0x310   :  { %v1287_v60 = vpop.f32.mrf.mxu0 }
 0x311   :  { %v482_v2 = vmax.f32 %v476_v61, 0.0 }
 0x312   :  { %v478_v63 = vpop.f32.mrf.mxu0 }
 0x313   :  { %v479_v0 = vadd.f32 %v1113_v9, %v478_v63 }
 0x314   :  { %v1288_v1 = vpop.f32.mrf.mxu0 }
 0x315   :  { %v483_v3 = vmax.f32 %v479_v0, 0.0 }
 0x317   :  { %v484_v4 = vpack.c.bf16 %v483_v3, %v482_v2 }
 0x319   :  { %1306 = vmatmul.mubr.bf16.vlgmr.msra.gmra.mxu1 %v484_v4 }
 0x31a   :  { %1363 = vmatprep.mubr.msk.bf16.mxu1 %vm1456_vm1, %v1455_v5 }
 0x3d9   :  { %v590_v7 = vpop.f32.mrf.mxu1 }
 0x3da   :  { %v591_v10 = vadd.f32 %v1122_v6, %v590_v7 }
 0x3db   :  { %v1307_v11 = vpop.f32.mrf.mxu1 }
 0x3dc   :  { %v597_v13 = vmax.f32 %v591_v10, 0.0 }
 0x3dd   :  { %v593_v12 = vpop.f32.mrf.mxu1 }
 0x3de   :  { %v594_v14 = vadd.f32 %v1122_v6, %v593_v12  ;;  %v608_v17 = vmul.f32 %v597_v13, %v597_v13 }
 0x3df   :  { %v1308_v15 = vpop.f32.mrf.mxu1 }
 0x3e0   :  { %v598_v16 = vmax.f32 %v594_v14, 0.0 }
 0x3e2   :  { %v601_v18 = vadd.f32 %v598_v16, %v597_v13  ;;  %v609_v19 = vmul.f32 %v598_v16, %v598_v16 }
 0x3e4   :  { %v602_v20 = vrot.slane %v601_v18, 4  ;;  %v610_v22 = vadd.f32 %v609_v19, %v608_v17 }
 0x3e6   :  { %v603_v23 = vadd.f32 %v602_v20, %v601_v18  ;;  %v611_v24 = vrot.slane %v610_v22, 4 }
 0x3e8   :  { %v604_v25 = vrot.slane %v603_v23, 2  ;;  %v612_v26 = vadd.f32 %v611_v24, %v610_v22  ;;  %v1418_v22 = vld [vmem:[%s1911_s9 + $0x8] sm:$0xff]  }
 0x3e9   :  { %v1422_v24 = vld [vmem:[%s1913_s11 + $0x28] sm:$0xff]  }
 0x3ea   :  { %v605_v27 = vadd.f32 %v604_v25, %v603_v23  ;;  %v613_v28 = vrot.slane %v612_v26, 2  ;;  %v1419_v23 = vld [vmem:[%s1911_s9] sm:$0xff]  }
 0x3eb   :  { %v1423_v25 = vld [vmem:[%s1913_s11 + $0x20] sm:$0xff]  }
 0x3ec   :  { %v606_v29 = vrot.slane %v605_v27, 1  ;;  %v614_v33 = vadd.f32 %v613_v28, %v612_v26  ;;  %v1424_v26 = vld [vmem:[%s1913_s11 + $0x18] sm:$0xff]  }
 0x3ee   :  { %v607_v34 = vadd.f32 %v606_v29, %v605_v27  ;;  %v615_v35 = vrot.slane %v614_v33, 1 }
 0x3f0   :  { %v616_v36 = vadd.f32 %v615_v35, %v614_v33  ;;  %v617_v38 = vmul.f32 0.0625, %v607_v34 }
 0x3f2   :  { %v618_v40 = vmul.f32 0.0625, %v616_v36  ;;  %v619_v41 = vmul.f32 %v617_v38, %v617_v38 }
 0x3f4   :  { %v620_v43 = vsub.f32 %v618_v40, %v619_v41  ;;  %v1426_v40 = vld [vmem:[%s1913_s11 + $0x8] sm:$0xff]   ;;  %v1427_v41 = vld [vmem:[%s1913_s11] sm:$0xff]  }
 0x3f6   :  { %v622_v44 = vadd.f32 1e-05, %v620_v43  ;;  %v1141_v43 = vld [vmem:[%s1912_s10] ss:$0 sm:$0xff] }
 0x3f8   :  { %1428 = vrsqrt.f32 %v622_v44 }
 0x405   :  { %v1429_v48 = vpop.eup %1428 }
 0x406   :  { %v624_v49 = vmul.f32 %v1429_v48, %v621_v45 }
 0x408   :  { %v629_v51 = vrot.slane %v624_v49, %v1778_v46  ;;  %v634_v53 = vmul.f32 %v624_v49, %v617_v38  ;;  %v1425_v38 = vld [vmem:[%s1913_s11 + $0x10] sm:$0xff]  }
 0x40a   :  { %v635_v54 = vsub.f32 %v633_v50, %v634_v53  ;;  %v632_v55 = vmul.f32 %v629_v51, %v598_v16  ;;  %v631_v56 = vmul.f32 %v629_v51, %v597_v13 }
 0x40c   :  { %v640_v58 = vrot.slane %v635_v54, %v1778_v46 }
 0x40e   :  { %v1785_v59 = vadd.f32 %v640_v58, %v631_v56  ;;  %v1787_v8 = vadd.f32 %v640_v58, %v632_v55 }
 0x410   :  { %v644_v30 = vpack.c.bf16 %v1787_v8, %v1785_v59 }
 0x412   :  { %1309 = vmatprep.subr.bf16.mxu0 %v644_v30 }
 0x413   :  { %1310 = vmatpush3.bf16.msra.mxu0 %v644_v30 }
 0x414   :  { %1327 = vmatprep.subr.bf16.mxu0 %v1455_v5 }
 0x416   :  { %1312 = vmatmul.mubr.msk.bf16.vlgmr.msra.gmra.mxu0 %vm198_vm4, %v1614_v31  ;;  %v1412_v31 = vld [vmem:[%s1911_s9 + $0x38] sm:$0xff]  }
 0x417   :  { %1315 = vmatprep.mubr.msk.bf16.mxu0 %vm198_vm4, %v1626_v37  ;;  %1348 = vmatpush3.bf16.msra.mxu1 %v1412_v31  ;;  %v1413_v37 = vld [vmem:[%s1911_s9 + $0x30] sm:$0xff]  }
 0x418   :  { %1349 = vmatprep.subr.bf16.mxu1 %v1455_v5 }
 0x41b   :  { %1350 = vmatpush3.bf16.msra.mxu1 %v1413_v37 }
 0x41c   :  { %1351 = vmatprep.subr.bf16.mxu1 %v1455_v5 }
 0x41e   :  { %1316 = vmatmul.mubr.msk.bf16.gmra.mxu0 %vm198_vm4, %v1634_v42  ;;  %v1414_v42 = vld [vmem:[%s1911_s9 + $0x28] sm:$0xff]  }
 0x41f   :  { %1319 = vmatprep.mubr.msk.bf16.mxu0 %vm198_vm4, %v1642_v47  ;;  %1352 = vmatpush3.bf16.msra.mxu1 %v1414_v42  ;;  %v1415_v47 = vld [vmem:[%s1911_s9 + $0x20] sm:$0xff]  }
 0x420   :  { %1353 = vmatprep.subr.bf16.mxu1 %v1455_v5 }
 0x423   :  { %1354 = vmatpush3.bf16.msra.mxu1 %v1415_v47 }
 0x424   :  { %1355 = vmatprep.subr.bf16.mxu1 %v1455_v5 }
 0x426   :  { %1320 = vmatmul.mubr.msk.bf16.gmra.mxu0 %vm198_vm4, %v1650_v52  ;;  %v1416_v52 = vld [vmem:[%s1911_s9 + $0x18] sm:$0xff]  }
 0x427   :  { %1323 = vmatprep.mubr.msk.bf16.mxu0 %vm198_vm4, %v1658_v57  ;;  %1356 = vmatpush3.bf16.msra.mxu1 %v1416_v52  ;;  %v1417_v57 = vld [vmem:[%s1911_s9 + $0x10] sm:$0xff]  }
 0x428   :  { %1357 = vmatprep.subr.bf16.mxu1 %v1455_v5 }
 0x42b   :  { %1358 = vmatpush3.bf16.msra.mxu1 %v1417_v57 }
 0x42c   :  { %1359 = vmatprep.subr.bf16.mxu1 %v1455_v5 }
 0x42e   :  { %1324 = vmatmul.mubr.msk.bf16.gmra.mxu0 %vm198_vm4, %v1666_v62 }
 0x42f   :  { %1343 = vmatprep.mubr.msk.bf16.mxu0 %vm1456_vm1, %v1455_v5  ;;  %1360 = vmatpush3.bf16.msra.mxu1 %v1418_v22 }
 0x430   :  { %1361 = vmatprep.subr.bf16.mxu1 %v1455_v5 }
 0x433   :  { %1362 = vmatpush3.bf16.msra.mxu1 %v1419_v23 }
 0x4d6   :  { %v1313_v62 = vpop.f32.mrf.mxu0 }
 0x4d8   :  { %v679_v9 = vpop.f32.mrf.mxu0 }
 0x4da   :  { %v1314_v32 = vpop.f32.mrf.mxu0 }
 0x4db   :  { %v743_v19 = vpack.c.bf16 %v1314_v32, %v1313_v62 }
 0x4dc   :  { %v682_v60 = vpop.f32.mrf.mxu0 }
 0x4dd   :  { %v742_v20 = vpack.c.bf16 %v682_v60, %v679_v9 }
 0x4de   :  { %v1317_v61 = vpop.f32.mrf.mxu0 }
 0x4e0   :  { %v695_v63 = vpop.f32.mrf.mxu0 }
 0x4e2   :  { %v1318_v0 = vpop.f32.mrf.mxu0 }
 0x4e3   :  { %v745_v17 = vpack.c.bf16 %v1318_v0, %v1317_v61 }
 0x4e4   :  { %v698_v1 = vpop.f32.mrf.mxu0 }
 0x4e5   :  { %v744_v18 = vpack.c.bf16 %v698_v1, %v695_v63 }
 0x4e6   :  { %v1321_v2 = vpop.f32.mrf.mxu0 }
 0x4e8   :  { %v711_v3 = vpop.f32.mrf.mxu0 }
 0x4ea   :  { %v1322_v4 = vpop.f32.mrf.mxu0 }
 0x4eb   :  { %v747_v15 = vpack.c.bf16 %v1322_v4, %v1321_v2 }
 0x4ec   :  { %v714_v6 = vpop.f32.mrf.mxu0 }
 0x4ed   :  { %v746_v16 = vpack.c.bf16 %v714_v6, %v711_v3 }
 0x4ee   :  { %v1325_v7 = vpop.f32.mrf.mxu0 }
 0x4f0   :  { %v727_v10 = vpop.f32.mrf.mxu0 }
 0x4f2   :  { %v1326_v11 = vpop.f32.mrf.mxu0 }
 0x4f3   :  { %v749_v12 = vpack.c.bf16 %v1326_v11, %v1325_v7 }
 0x4f4   :  { %v730_v13 = vpop.f32.mrf.mxu0 }
 0x4f5   :  { %1328 = vmatpush3.bf16.msra.mxu0 %v749_v12  ;;  %v748_v14 = vpack.c.bf16 %v730_v13, %v727_v10 }
 0x4f6   :  { %1329 = vmatprep.subr.bf16.mxu0 %v1455_v5 }
 0x4f9   :  { %1330 = vmatpush3.bf16.msra.mxu0 %v748_v14 }
 0x4fa   :  { %1331 = vmatprep.subr.bf16.mxu0 %v1455_v5 }
 0x4fd   :  { %1332 = vmatpush3.bf16.msra.mxu0 %v747_v15  ;;  %v1043_v15 = vld [vmem:[%s1915_s13] sm:$0x1]  ;;  %s1432_s13 = scalar_lea.vmem %s1074_s18, 256 }
 0x4fe   :  { %1333 = vmatprep.subr.bf16.mxu0 %v1455_v5  ;;  %p1433_p0 = scmp.ne.s32.totalorder %s1074_s18, %s1432_s13  ;;  %p1438_p2 = scmp.lt.s32.totalorder %s1432_s13, %s1432_s13 }
 0x500   :  { %p1439_p3 = por %p1438_p2, %p1437_p1 }
 0x501   :  { %1334 = vmatpush3.bf16.msra.mxu0 %v746_v16 }
 0x502   :  { %1335 = vmatprep.subr.bf16.mxu0 %v1455_v5  ;;  %p1440_p4 = pnand %p1439_p3, %p1433_p0 }
 0x505   :  { %1336 = vmatpush3.bf16.msra.mxu0 %v745_v17 }
 0x506   :  { %1337 = vmatprep.subr.bf16.mxu0 %v1455_v5 }
 0x509   :  { %1338 = vmatpush3.bf16.msra.mxu0 %v744_v18  ;;  %v1055_v18 = vld [vmem:[%s1916_s14] sm:$0x1] }
 0x50a   :  { %1339 = vmatprep.subr.bf16.mxu0 %v1455_v5 }
 0x50d   :  { %1340 = vmatpush3.bf16.msra.mxu0 %v743_v19 }
 0x50e   :  { %1341 = vmatprep.subr.bf16.mxu0 %v1455_v5 }
 0x511   :  { %1342 = vmatpush3.bf16.msra.mxu0 %v742_v20 }
 0x512   :  { %1367 = vmatprep.subr.bf16.mxu0 %v1455_v5 }
 0x514   :  { %1344 = vmatmul.mubr.msk.bf16.vlgmr.msra.gmra.mxu0 %vm1713_vm5, %v1457_v39  ;;  %v1421_v39 = vld [vmem:[%s1913_s11 + $0x30] sm:$0xff]  }
 0x515   :  { %1383 = vmatprep.mubr.msk.bf16.mxu0 %vm1456_vm1, %v1455_v5  ;;  %1368 = vmatpush3.bf16.msra.mxu0 %v1420_v21 }
 0x516   :  { %1369 = vmatprep.subr.bf16.mxu0 %v1455_v5 }
 0x519   :  { %1370 = vmatpush3.bf16.msra.mxu0 %v1421_v39 }
 0x51a   :  { %1371 = vmatprep.subr.bf16.mxu0 %v1455_v5 }
 0x51d   :  { %1372 = vmatpush3.bf16.msra.mxu0 %v1422_v24 }
 0x51e   :  { %1373 = vmatprep.subr.bf16.mxu0 %v1455_v5 }
 0x521   :  { %1374 = vmatpush3.bf16.msra.mxu0 %v1423_v25 }
 0x522   :  { %1375 = vmatprep.subr.bf16.mxu0 %v1455_v5 }
 0x525   :  { %1376 = vmatpush3.bf16.msra.mxu0 %v1424_v26 }
 0x526   :  { %1377 = vmatprep.subr.bf16.mxu0 %v1455_v5 }
 0x529   :  { %1378 = vmatpush3.bf16.msra.mxu0 %v1425_v38 }
 0x52a   :  { %1379 = vmatprep.subr.bf16.mxu0 %v1455_v5 }
 0x52d   :  { %1380 = vmatpush3.bf16.msra.mxu0 %v1426_v40 }
 0x52e   :  { %1381 = vmatprep.subr.bf16.mxu0 %v1455_v5  ;;  %v1150_v5 = vld [vmem:[%s1914_s12] ss:$0 sm:$0xff] }
 0x531   :  { %1382 = vmatpush3.bf16.msra.mxu0 %v1427_v41 }
 0x5d4   :  { %v784_v27 = vpop.f32.mrf.mxu0 }
 0x5d5   :  { %v785_v33 = vadd.f32 %v784_v27, %v1785_v59 }
 0x5d6   :  { %v1345_v28 = vpop.f32.mrf.mxu0 }
 0x5d8   :  { %v787_v29 = vpop.f32.mrf.mxu0 }
 0x5d9   :  { %v788_v34 = vadd.f32 %v787_v29, %v1787_v8 }
 0x5da   :  { %v1346_v35 = vpop.f32.mrf.mxu0 }
 0x5db   :  { %v791_v36 = vpack.c.bf16 %v788_v34, %v785_v33 }
 0x5dd   :  { %1364 = vmatmul.mubr.bf16.vlgmr.msra.gmra.mxu1 %v791_v36 }
 0x69d   :  { %v897_v44 = vpop.f32.mrf.mxu1 }
 0x69e   :  { %v898_v48 = vadd.f32 %v1141_v43, %v897_v44 }
 0x69f   :  { %v1365_v45 = vpop.f32.mrf.mxu1 }
 0x6a0   :  { %v904_v53 = vmax.f32 %v898_v48, 0.0 }
 0x6a1   :  { %v900_v49 = vpop.f32.mrf.mxu1 }
 0x6a2   :  { %v901_v50 = vadd.f32 %v1141_v43, %v900_v49 }
 0x6a3   :  { %v1366_v51 = vpop.f32.mrf.mxu1 }
 0x6a4   :  { %v905_v54 = vmax.f32 %v901_v50, 0.0 }
 0x6a6   :  { %v906_v55 = vpack.c.bf16 %v905_v54, %v904_v53 }
 0x6a8   :  { %1384 = vmatmul.mubr.bf16.vlgmr.msra.gmra.mxu0 %v906_v55 }
 0x768   :  { %v1012_v56 = vpop.f32.mrf.mxu0 }
 0x769   :  { %v1013_v58 = vadd.f32 %v1150_v5, %v1012_v56 }
 0x76a   :  { %v1385_v59 = vpop.f32.mrf.mxu0 }
 0x76b   :  { %v1019_v30 = vmax.f32 %v1013_v58, 0.0 }
 0x76c   :  { %v1015_v8 = vpop.f32.mrf.mxu0 }
 0x76d   :  { %v1016_v31 = vadd.f32 %v1150_v5, %v1015_v8  ;;  %v1030_v47 = vmul.f32 %v1019_v30, %v1019_v30 }
 0x76e   :  { %v1386_v37 = vpop.f32.mrf.mxu0 }
 0x76f   :  { %v1020_v42 = vmax.f32 %v1016_v31, 0.0 }
 0x771   :  { %v1023_v52 = vadd.f32 %v1020_v42, %v1019_v30  ;;  %v1031_v57 = vmul.f32 %v1020_v42, %v1020_v42 }
 0x773   :  { %v1024_v62 = vrot.slane %v1023_v52, 4  ;;  %v1032_v9 = vadd.f32 %v1031_v57, %v1030_v47 }
 0x775   :  { %v1025_v32 = vadd.f32 %v1024_v62, %v1023_v52  ;;  %v1033_v60 = vrot.slane %v1032_v9, 4 }
 0x777   :  { %v1026_v61 = vrot.slane %v1025_v32, 2  ;;  %v1034_v63 = vadd.f32 %v1033_v60, %v1032_v9 }
 0x779   :  { %v1027_v0 = vadd.f32 %v1026_v61, %v1025_v32  ;;  %v1035_v1 = vrot.slane %v1034_v63, 2 }
 0x77b   :  { %v1028_v2 = vrot.slane %v1027_v0, 1  ;;  %v1036_v3 = vadd.f32 %v1035_v1, %v1034_v63 }
 0x77d   :  { %v1029_v4 = vadd.f32 %v1028_v2, %v1027_v0  ;;  %v1037_v6 = vrot.slane %v1036_v3, 1 }
 0x77f   :  { %v1038_v7 = vadd.f32 %v1037_v6, %v1036_v3  ;;  %v1039_v10 = vmul.f32 0.0625, %v1029_v4 }
 0x781   :  { %v1040_v11 = vmul.f32 0.0625, %v1038_v7  ;;  %v1041_v12 = vmul.f32 %v1039_v10, %v1039_v10 }
 0x783   :  { %v1042_v13 = vsub.f32 %v1040_v11, %v1041_v12 }
 0x785   :  { %v1044_v14 = vadd.f32 1e-05, %v1042_v13 }
 0x787   :  { %1430 = vrsqrt.f32 %v1044_v14 }
 0x794   :  { %v1431_v16 = vpop.eup %1430 }
 0x795   :  { %v1046_v17 = vmul.f32 %v1431_v16, %v1043_v15 }
 0x797   :  { %v1051_v19 = vrot.slane %v1046_v17, %v1778_v46  ;;  %v1056_v20 = vmul.f32 %v1046_v17, %v1039_v10 }
 0x799   :  { %v1057_v22 = vsub.f32 %v1055_v18, %v1056_v20  ;;  %v1053_v23 = vmul.f32 %v1051_v19, %v1019_v30  ;;  %v1054_v21 = vmul.f32 %v1051_v19, %v1020_v42 }
 0x79b   :  { %v1062_v39 = vrot.slane %v1057_v22, %v1778_v46 }
 0x79d   :  { %v1065_v24 = vadd.f32 %v1062_v39, %v1054_v21  ;;  %v1064_v25 = vadd.f32 %v1062_v39, %v1053_v23 }
 0x79f   :  { %1067 = vst [vmem:[#allocation2 + $0x8] sm:$0xff] %v1065_v24  ;;  %1066 = vst [vmem:[#allocation2] sm:$0xff] %v1064_v25 }
 0x7a0   :  { %1443 = shalt.err (!%p1440_p4)
}
 0x7a1   :  { %s1459_s14 = smov 128   ;;  %s1460_s19 = smov 8  }
 0x7a2   :  { %1079 = dma.vmem_to_hbm [thread:$0]  %s1074_s18, 256, %s1917_s15, [#allocation3], %s1459_s14, %s1459_s14, %s1460_s19  }
 0x7a3   :  { %1452 = dma.done.wait [#allocation3], 256  }
 0x7a4   :  { %1453 = vsyncadd [#allocation3], 4294967040 }
 0x7a5   :  { %1083 = vsyncpa [#allocation3], 1 }

</bundles_post_ra>
